<compile_context>
chip_gen: v5e
topology: v5e:2x2
jax: 0.10.0
libtpu: 0.0.40
codegen_flags: <defaults>
</compile_context>

<pallas_src>
import functools

import jax
import jax.numpy as jnp
from jax import lax
from jax.experimental import pallas as pl
from jax.experimental.pallas import tpu as pltpu

_BN_EPS = 1e-5


def _bn_relu(y, gamma, beta):
    """Training-mode BatchNorm1d (batch stats, biased variance) fused into one FMA + ReLU.

    y: (N, t) f32 pre-activations; gamma/beta: (1, t) f32.
    Stat reductions go through the MXU (ones-row dot) rather than cross-sublane VPU sums.
    """
    n = y.shape[0]
    inv_n = jnp.float32(1.0 / n)
    ones = jnp.ones((1, n), dtype=jnp.float32)
    s1 = jnp.dot(ones, y, preferred_element_type=jnp.float32)      # (1, t)
    s2 = jnp.dot(ones, y * y, preferred_element_type=jnp.float32)  # (1, t)
    mean = s1 * inv_n
    # One-pass variance can go slightly negative under cancellation -> clamp before rsqrt.
    var = jnp.maximum(s2 * inv_n - mean * mean, 0.0)
    scale = gamma * lax.rsqrt(var + _BN_EPS)   # rsqrt on the EUP
    shift = beta - mean * scale
    return jnp.maximum(y * scale + shift, 0.0)


def _residual_concat_kernel(x_mm_ref, wt_ref, g_ref, b_ref, x_copy_ref, out_ref,
                            *, n_compute_blocks):
    j = pl.program_id(0)

    @pl.when(j < n_compute_blocks)
    def _compute():
        # Linear WITHOUT bias: with training-mode BN right after, the bias is cancelled
        # exactly by the batch-mean subtraction.
        y = jnp.dot(x_mm_ref[...], wt_ref[...], preferred_element_type=jnp.float32)
        out_ref[...] = _bn_relu(y, g_ref[...], b_ref[...]).astype(out_ref.dtype)

    @pl.when(j >= n_compute_blocks)
    def _copy():
        # Pass-through of x into the trailing columns of the (N, O+I) output; the concat
        # is carried by the kernel's own output DMA (no extra HBM pass in the wrapper).
        out_ref[...] = x_copy_ref[...].astype(out_ref.dtype)


def _fc_bn_relu_kernel(x_ref, wt_ref, g_ref, b_ref, out_ref):
    """Fallback (non-128-aligned feature dims): single full-width fused tile."""
    y = jnp.dot(x_ref[...], wt_ref[...], preferred_element_type=jnp.float32)
    out_ref[...] = _bn_relu(y, g_ref[...], b_ref[...]).astype(out_ref.dtype)


def _vmem_limit_bytes():
    try:
        cap = int(pltpu.get_tpu_info().vmem_capacity_bytes)  # 64 MiB v7x, 128 MiB v5e/v6e
    except Exception:
        cap = 64 << 20  # conservative: assume the smallest per-core VMEM (v7x)
    return (3 * cap) // 4  # leave headroom for compiler-internal scratch


def _pick_col_tile(n, i, o, x_bytes, w_bytes, out_bytes, budget):
    """Column tile t for the fused-concat path: lane-aligned, divides O and I, fits VMEM."""
    if (o % 128) or (i % 128):
        # TODO(synk): pad O / I to multiples of 128 for production shapes; for misaligned
        # small shapes we fall back to a single full-width tile + wrapper concat.
        return None
    chosen = 128
    for t in (512, 256, 128):
        if (o % t) or (i % t):
            continue
        need = (2 * n * i * x_bytes        # resident x for the matmul (pipeliner double-buffers)
                + 2 * i * t * w_bytes      # double-buffered weight tile
                + 2 * n * t * x_bytes      # double-buffered x pass-through tile
                + 2 * n * t * out_bytes    # double-buffered output tile
                + n * t * 4                # f32 y intermediate
                + 4 * t * 8)               # gamma/beta tiles
        if need <= (budget * 85) // 100:
            chosen = t
            break
    return chosen


def residual_forward(x, w, b, gamma, beta, *, matmul_in_bf16=False):
    """out = concat([relu(batchnorm_train(linear(x))), x], dim=1).

    `b` (Linear bias) is accepted for API parity with the PyTorch module but is unused:
    training-mode BatchNorm cancels it exactly.  (Eval-mode BN with running stats would
    need the bias.)
    """
    del b
    N, I = x.shape
    O = w.shape[0]
    out_dtype = x.dtype

    mm_dtype = jnp.bfloat16 if matmul_in_bf16 else x.dtype
    x_mm = x.astype(mm_dtype)
    wt = jnp.transpose(w).astype(mm_dtype)          # (I, O): MXU-ready, transposed once
    g2 = gamma.astype(jnp.float32).reshape(1, O)
    be2 = beta.astype(jnp.float32).reshape(1, O)

    vmem_limit = _vmem_limit_bytes()
    itemsize_mm = jnp.dtype(mm_dtype).itemsize
    itemsize_out = jnp.dtype(out_dtype).itemsize
    t = _pick_col_tile(N, I, O, itemsize_mm, itemsize_mm, itemsize_out, vmem_limit)

    cost = pl.CostEstimate(
        flops=2 * N * I * O + 6 * N * O,
        transcendentals=O,
        bytes_accessed=(N * I * itemsize_mm + I * O * itemsize_mm
                        + N * I * jnp.dtype(x.dtype).itemsize + 8 * O
                        + N * (O + I) * itemsize_out),
    )
    params = pltpu.CompilerParams(
        dimension_semantics=("parallel",),   # column blocks are independent -> megacore
        vmem_limit_bytes=vmem_limit,
    )

    if t is not None:
        n_o = O // t
        n_i = I // t
        kernel = functools.partial(_residual_concat_kernel, n_compute_blocks=n_o)

        def _w_map(j):
            return (0, jnp.minimum(j, n_o - 1))

        def _xcopy_map(j):
            return (0, jnp.minimum(jnp.maximum(j - n_o, 0), n_i - 1))

        return pl.pallas_call(
            kernel,
            out_shape=jax.ShapeDtypeStruct((N, O + I), out_dtype),
            grid_spec=pltpu.PrefetchScalarGridSpec(
                num_scalar_prefetch=0,
                grid=(n_o + n_i,),
                in_specs=[
                    # Full x resident for the matmul; grid-invariant index -> fetched once.
                    pl.BlockSpec((N, I), lambda j: (0, 0)),
                    pl.BlockSpec((I, t), _w_map),    # weight feature tile (clamped in copy phase)
                    pl.BlockSpec((1, t), _w_map),    # gamma tile
                    pl.BlockSpec((1, t), _w_map),    # beta tile
                    # x again, column-tiled, original dtype, for the pass-through phase.
                    pl.BlockSpec((N, t), _xcopy_map),
                ],
                out_specs=pl.BlockSpec((N, t), lambda j: (0, j)),
            ),
            compiler_params=params,
            cost_estimate=cost,
        )(x_mm, wt, g2, be2, x)

    # Fallback: feature dims not 128-aligned -> single full-width fused tile, concat in XLA.
    fc = pl.pallas_call(
        _fc_bn_relu_kernel,
        out_shape=jax.ShapeDtypeStruct((N, O), out_dtype),
        grid_spec=pltpu.PrefetchScalarGridSpec(
            num_scalar_prefetch=0,
            grid=(1,),
            in_specs=[
                pl.BlockSpec((N, I), lambda j: (0, 0)),
                pl.BlockSpec((I, O), lambda j: (0, 0)),
                pl.BlockSpec((1, O), lambda j: (0, 0)),
                pl.BlockSpec((1, O), lambda j: (0, 0)),
            ],
            out_specs=pl.BlockSpec((N, O), lambda j: (0, 0)),
        ),
        compiler_params=params,
        cost_estimate=cost,
    )(x_mm, wt, g2, be2)
    return jnp.concatenate([fc, x], axis=1)


def residual_reference(x, w, b, gamma, beta):
    y = x @ w.T + b
    mean = jnp.mean(y, axis=0, keepdims=True)
    var = jnp.mean((y - mean) ** 2, axis=0, keepdims=True)
    y_bn = (y - mean) / jnp.sqrt(var + _BN_EPS) * gamma + beta
    return jnp.concatenate([jnp.maximum(y_bn, 0.0), x], axis=1)


if __name__ == "__main__":
    N, I, O = 8, 128, 128  # small, lane-aligned demo sizes (batch, in_features, out_features)

    key = jax.random.PRNGKey(0)
    kx, kw, kb, kg, kbe = jax.random.split(key, 5)

    x = jax.random.normal(kx, (N, I), dtype=jnp.float32)

    # PyTorch Linear-style uniform init.
    bound = 1.0 / jnp.sqrt(jnp.float32(I))
    w = jax.random.uniform(kw, (O, I), dtype=jnp.float32, minval=-bound, maxval=bound)
    b = jax.random.uniform(kb, (O,), dtype=jnp.float32, minval=-bound, maxval=bound)
    # Non-trivial BN affine params to exercise scale/shift.
    gamma = 0.75 + 0.5 * jax.random.uniform(kg, (O,), dtype=jnp.float32)
    beta = 0.1 * jax.random.normal(kbe, (O,), dtype=jnp.float32)

    out = residual_forward(x, w, b, gamma, beta)
    out = jax.block_until_ready(out)

    ref = residual_reference(x, w, b, gamma, beta)
    assert out.shape == (N, O + I)
    assert bool(jnp.allclose(out, ref, atol=1e-4, rtol=1e-4))

    # bf16 MXU-feed path (looser tolerance; accumulation and BN stats stay f32).
    out_bf16 = residual_forward(x, w, b, gamma, beta, matmul_in_bf16=True)
    out_bf16 = jax.block_until_ready(out_bf16)
    assert out_bf16.shape == (N, O + I)
    assert bool(jnp.allclose(out_bf16, ref, atol=5e-2, rtol=5e-2))

    print("KERNEL_OK")
</pallas_src>

<mosaic_0001>
module attributes {stable_mosaic.version = 11 : i64} {
  func.func @_residual_concat_kernel(%arg0: i32, %arg1: memref<8x128xf32, #tpu.memory_space<vmem>>, %arg2: memref<128x128xf32, #tpu.memory_space<vmem>>, %arg3: memref<1x128xf32, #tpu.memory_space<vmem>>, %arg4: memref<1x128xf32, #tpu.memory_space<vmem>>, %arg5: memref<8x128xf32, #tpu.memory_space<vmem>>, %arg6: memref<8x128xf32, #tpu.memory_space<vmem>>) attributes {dimension_semantics = [#tpu.dimension_semantics<parallel>], iteration_bounds = array<i64: 2>, scalar_prefetch = 0 : i64, scratch_operands = 0 : i64, tpu.core_type = #tpu.core_type<tc>, window_params = [{pipeline_mode = #tpu.pipeline_mode<synchronous>, transform_indices = @transform_0, window_bounds = array<i64: 8, 128>}, {transform_indices = @transform_1, window_bounds = array<i64: 128, 128>}, {transform_indices = @transform_2, window_bounds = array<i64: 1, 128>}, {transform_indices = @transform_3, window_bounds = array<i64: 1, 128>}, {transform_indices = @transform_4, window_bounds = array<i64: 8, 128>}, {transform_indices = @transform_5, window_bounds = array<i64: 8, 128>}]} {
    %c1_i32 = arith.constant 1 : i32
    %0 = arith.cmpi slt, %arg0, %c1_i32 : i32
    %1 = arith.extui %0 : i1 to i32
    %c0_i32 = arith.constant 0 : i32
    %2 = arith.cmpi ne, %1, %c0_i32 : i32
    scf.if %2 {
      %c0 = arith.constant 0 : index
      %c0_2 = arith.constant 0 : index
      %6 = vector.load %arg1[%c0, %c0_2] : memref<8x128xf32, #tpu.memory_space<vmem>>, vector<8x128xf32>
      %c0_3 = arith.constant 0 : index
      %c0_4 = arith.constant 0 : index
      %7 = vector.load %arg2[%c0_3, %c0_4] : memref<128x128xf32, #tpu.memory_space<vmem>>, vector<128x128xf32>
      %cst = arith.constant dense<0.000000e+00> : vector<8x128xf32>
      %8 = tpu.matmul %6, %7, %cst {dimension_numbers = #tpu.dot_dimension_numbers<[1], [0], [0], [1], [0, 0, 1, 1], [], []>} : vector<8x128xf32>, vector<128x128xf32>, vector<8x128xf32> -> vector<8x128xf32>
      %c0_5 = arith.constant 0 : index
      %c0_6 = arith.constant 0 : index
      %9 = vector.load %arg3[%c0_5, %c0_6] : memref<1x128xf32, #tpu.memory_space<vmem>>, vector<1x128xf32>
      %c0_7 = arith.constant 0 : index
      %c0_8 = arith.constant 0 : index
      %10 = vector.load %arg4[%c0_7, %c0_8] : memref<1x128xf32, #tpu.memory_space<vmem>>, vector<1x128xf32>
      %cst_9 = arith.constant 1.000000e+00 : f32
      %11 = vector.broadcast %cst_9 : f32 to vector<1x8xf32>
      %cst_10 = arith.constant dense<0.000000e+00> : vector<1x128xf32>
      %12 = tpu.matmul %11, %8, %cst_10 {dimension_numbers = #tpu.dot_dimension_numbers<[1], [0], [0], [1], [0, 0, 1, 1], [], []>} : vector<1x8xf32>, vector<8x128xf32>, vector<1x128xf32> -> vector<1x128xf32>
      %13 = arith.mulf %8, %8 : vector<8x128xf32>
      %cst_11 = arith.constant dense<0.000000e+00> : vector<1x128xf32>
      %14 = tpu.matmul %11, %13, %cst_11 {dimension_numbers = #tpu.dot_dimension_numbers<[1], [0], [0], [1], [0, 0, 1, 1], [], []>} : vector<1x8xf32>, vector<8x128xf32>, vector<1x128xf32> -> vector<1x128xf32>
      %cst_12 = arith.constant 1.250000e-01 : f32
      %15 = vector.broadcast %cst_12 : f32 to vector<1x128xf32>
      %16 = arith.mulf %12, %15 : vector<1x128xf32>
      %cst_13 = arith.constant 1.250000e-01 : f32
      %17 = vector.broadcast %cst_13 : f32 to vector<1x128xf32>
      %18 = arith.mulf %14, %17 : vector<1x128xf32>
      %19 = arith.mulf %16, %16 : vector<1x128xf32>
      %20 = arith.subf %18, %19 : vector<1x128xf32>
      %cst_14 = arith.constant 0.000000e+00 : f32
      %21 = vector.broadcast %cst_14 : f32 to vector<1x128xf32>
      %22 = arith.maximumf %20, %21 : vector<1x128xf32>
      %cst_15 = arith.constant 9.99999974E-6 : f32
      %23 = vector.broadcast %cst_15 : f32 to vector<1x128xf32>
      %24 = arith.addf %22, %23 : vector<1x128xf32>
      %25 = math.rsqrt %24 : vector<1x128xf32>
      %26 = arith.mulf %9, %25 : vector<1x128xf32>
      %27 = arith.mulf %16, %26 : vector<1x128xf32>
      %28 = arith.subf %10, %27 : vector<1x128xf32>
      %29 = vector.broadcast %26 : vector<1x128xf32> to vector<8x128xf32>
      %30 = arith.mulf %8, %29 : vector<8x128xf32>
      %31 = vector.broadcast %28 : vector<1x128xf32> to vector<8x128xf32>
      %32 = arith.addf %30, %31 : vector<8x128xf32>
      %cst_16 = arith.constant 0.000000e+00 : f32
      %33 = vector.broadcast %cst_16 : f32 to vector<8x128xf32>
      %34 = arith.maximumf %32, %33 : vector<8x128xf32>
      %c0_17 = arith.constant 0 : index
      %c0_18 = arith.constant 0 : index
      %35 = vector.load %arg6[%c0_17, %c0_18] : memref<8x128xf32, #tpu.memory_space<vmem>>, vector<8x128xf32>
      tpu.vector_store %arg6[%c0_17, %c0_18], %34 {strides = array<i32>} : memref<8x128xf32, #tpu.memory_space<vmem>>, vector<8x128xf32>,
    } else {
    }
    %c1_i32_0 = arith.constant 1 : i32
    %3 = arith.cmpi sge, %arg0, %c1_i32_0 : i32
    %4 = arith.extui %3 : i1 to i32
    %c0_i32_1 = arith.constant 0 : i32
    %5 = arith.cmpi ne, %4, %c0_i32_1 : i32
    scf.if %5 {
      %c0 = arith.constant 0 : index
      %c0_2 = arith.constant 0 : index
      %6 = vector.load %arg5[%c0, %c0_2] : memref<8x128xf32, #tpu.memory_space<vmem>>, vector<8x128xf32>
      %c0_3 = arith.constant 0 : index
      %c0_4 = arith.constant 0 : index
      %7 = vector.load %arg6[%c0_3, %c0_4] : memref<8x128xf32, #tpu.memory_space<vmem>>, vector<8x128xf32>
      tpu.vector_store %arg6[%c0_3, %c0_4], %6 {strides = array<i32>} : memref<8x128xf32, #tpu.memory_space<vmem>>, vector<8x128xf32>,
    } else {
    }
    return
  }
  func.func @transform_0(%arg0: i32) -> (i32, i32) {
    %c0_i32 = arith.constant 0 : i32
    %c0_i32_0 = arith.constant 0 : i32
    %c0_i32_1 = arith.constant 0 : i32
    return %c0_i32, %c0_i32_0 : i32, i32
  }
  func.func @transform_1(%arg0: i32) -> (i32, i32) {
    %c0_i32 = arith.constant 0 : i32
    %0 = arith.minsi %arg0, %c0_i32 : i32
    %c0_i32_0 = arith.constant 0 : i32
    %c0_i32_1 = arith.constant 0 : i32
    return %c0_i32_0, %0 : i32, i32
  }
  func.func @transform_2(%arg0: i32) -> (i32, i32) {
    %c0_i32 = arith.constant 0 : i32
    %0 = arith.minsi %arg0, %c0_i32 : i32
    %c0_i32_0 = arith.constant 0 : i32
    %c0_i32_1 = arith.constant 0 : i32
    return %c0_i32_0, %0 : i32, i32
  }
  func.func @transform_3(%arg0: i32) -> (i32, i32) {
    %c0_i32 = arith.constant 0 : i32
    %0 = arith.minsi %arg0, %c0_i32 : i32
    %c0_i32_0 = arith.constant 0 : i32
    %c0_i32_1 = arith.constant 0 : i32
    return %c0_i32_0, %0 : i32, i32
  }
  func.func @transform_4(%arg0: i32) -> (i32, i32) {
    %c1_i32 = arith.constant 1 : i32
    %0 = arith.subi %arg0, %c1_i32 : i32
    %c0_i32 = arith.constant 0 : i32
    %1 = arith.maxsi %0, %c0_i32 : i32
    %c0_i32_0 = arith.constant 0 : i32
    %2 = arith.minsi %1, %c0_i32_0 : i32
    %c0_i32_1 = arith.constant 0 : i32
    %c0_i32_2 = arith.constant 0 : i32
    return %c0_i32_1, %2 : i32, i32
  }
  func.func @transform_5(%arg0: i32) -> (i32, i32) {
    %c0_i32 = arith.constant 0 : i32
    %c0_i32_0 = arith.constant 0 : i32
    return %c0_i32, %arg0 : i32, i32
  }
}

</mosaic_0001>

<bundles_post_ra>
// kernel: tpu_custom_call.1
= control target key start
LH: loop header
LB: loop body
LE: loop exit
PB: predicated region body
PF: predicated region fallthrough
CT: control target
= control target key end

     0   :  { %s1251_s0 = inlined_call_operand.hbm [shape: f32[8,128], index: 0, kind: input, shape index: {}]   ;;  %s1252_s1 = inlined_call_operand.hbm [shape: f32[128,128], index: 1, kind: input, shape index: {}]   ;;  %s1253_s2 = inlined_call_operand.vmem [shape: f32[1,128], index: 2, kind: input, shape index: {}]   ;;  %s1254_s3 = inlined_call_operand.vmem [shape: f32[1,128], index: 3, kind: input, shape index: {}]   ;;  %s1255_s4 = inlined_call_operand.hbm [shape: f32[8,128], index: 4, kind: input, shape index: {}]   ;;  %s1256_s5 = inlined_call_operand.hbm [shape: f32[8,256], index: 5, kind: output, shape index: {}]  }
   0x1   :  { %1257 = sst [smem:[#allocation13_spill]] %s1251_s0 }
   0x2   :  { %10 = vsyncpa [#allocation3], 0 }
   0x3   :  { %11 = vsyncpa [#allocation6], 0 }
   0x4   :  { %13 = vsyncpa [#allocation6 + $0x1], 0 }
   0x5   :  { %14 = vsyncpa [#allocation4], 0 }
   0x6   :  { %16 = vsyncpa [#allocation4 + $0x1], 0  ;;  %s1000_s18 = smov 0   ;;  %s1002_s19 = smov 0  }
   0x7   :  { %s1004_s20 = smov 0   ;;  %s1006_s21 = smov 0  }
   0x8   :  { %s1008_s22 = smov 0   ;;  %s1010_s23 = smov 0  }
   0x9   :  { %s1012_s24 = smov 0  }
   0xa LB: > { %s1036_s25 = sadd.s32 1, %s963_s24   ;;  %p47_p0 = scmp.lt.s32.totalorder %s963_s24, 0  ;;  %s963_s24 = sphi %s1012_s24, %s1273_s24   ;;  %s959_s23 = sphi %s1010_s23, %s1272_s23   ;;  %s955_s22 = sphi %s1008_s22, %s1271_s22   ;;  %s951_s21 = sphi %s1006_s21, %s1270_s21   ;;  %s947_s20 = sphi %s1004_s20, %s1269_s20   ;;  %s943_s19 = sphi %s1002_s19, %s1268_s19   ;;  %s939_s18 = sphi %s1000_s18, %s1267_s18  }
   0xb   : > { %p49_p1 = scmp.lt.s32.totalorder %s1036_s25, 0  ;;  %s54_s26 = sadd.s32 1, %s959_s23 }
   0xc   : > { %s48_s27 = scalar_select %p47_p0, %s963_s24, 0 }
   0xd   : > { %s50_s28 = scalar_select %p49_p1, %s1036_s25, 0 }
   0xe   : > { %p61_p2 = scmp.ne.s32.totalorder %s959_s23, %s955_s22  ;;  %p62_p3 = scmp.eq.s32.totalorder %s963_s24, 0 }
   0xf   : > { %s51_s29 = ssub.s32 %s48_s27, %s50_s28  ;;  %s173_s30 = ssub.s32 %s963_s24, %s1036_s25 }
  0x10   : > { %p52_p4 = scmp.eq.s32.totalorder %s51_s29, 0  ;;  %p1050_p5 = por %p62_p3, %p61_p2 }
  0x11   : > { %p1054_p6 = scmp.eq.s32.totalorder %s173_s30, 0  ;;  %p709_p8 = scmp.lt.s32.totalorder %s963_s24, 2 }
  0x12   : > { %s1060_s8 = scalar_select %p52_p4, %s959_s23, %s54_s26  }
  0x13   : > { %s225_s9 = sand.u32 1, %s963_s24   ;;  %s227_s10 = sand.u32 1, %s959_s23  }
  0x14   : > { %s654_s11 = sshll.u32 %s227_s10, 7  ;;  %s655_s12 = sshll.u32 %s48_s27, 3 }
  0x15   : > { %s235_s15 = scalar_lea.hbm %s1252_s1, %s655_s12  ;;  %s229_s17 = scalar_lea.vmem [#allocation5], %s654_s11 }
  0x16   : > { %s236_s16 = sshll.u32 %s235_s15, 4  ;;  %s238_s28 = sshll.u32 %s229_s17, 4  ;;  %s237_s16 = int_to_ptr.hbm [resolvable:$true] %s236_s16  ;;  %s239_s28 = int_to_ptr.vmem [resolvable:$true] %s238_s28 }
  0x17   : > { %p1072_p9 = pnand %p709_p8, %p1050_p5  ;;  %s1076_s26 = scalar_lea.sflag [#allocation6], %s225_s9 }
  0x18   : > { %s775_s30 = sshra.s32 %s237_s16, 4  ;;  %s782_s6 = scalar_lea.hbm %s1252_s1, 128  ;;  %s776_s30 = int_to_ptr.hbm [resolvable:$true] %s775_s30 }
  0x19   : > { %s777_s27 = scalar_lea.hbm %s776_s30, 128  ;;  %p779_p11 = pneg %p1072_p9 }
  0x1a   : > { %p778_p10 = scmp.ne.s32.totalorder %s776_s30, %s777_s27  ;;  %p783_p0 = scmp.lt.s32.totalorder %s776_s30, %s1252_s1 }
  0x1b   : > { %p784_p1 = scmp.lt.s32.totalorder %s782_s6, %s777_s27 }
  0x1c   : > { %p780_p12 = pnand %p779_p11, %p778_p10 }
  0x1d   : > { %p785_p2 = por %p784_p1, %p783_p0 }
  0x1e   : > { %p781_p13 = pneg %p780_p12 }
  0x20   : > { %p786_p4 = pnand %p785_p2, %p781_p13 }
  0x22   : > { %789 = shalt.err (!%p786_p4)
}
  0x23   : > { %s965_s9 = smov 128   ;;  %s966_s14 = smov 8  }
  0x24   : > { %700 = dma.hbm_to_vmem [thread:$0]  (!%p1072_p9), %s237_s16, 2048, %s239_s28, %s1076_s26, %s965_s9, %s965_s9, %s966_s14  }
  0x25   : > { %s1090_s15 = sadd.s32 4294967295, %s963_s24   ;;  %s638_s17 = sadd.s32 4294967294, %s963_s24  }
  0x26   : > { %p67_p5 = scmp.ne.s32.totalorder %s955_s22, %s951_s21  ;;  %p68_p10 = scmp.eq.s32.totalorder %s1090_s15, 0 }
  0x27   : > { %s176_s30 = sadd.s32 1, %s947_s20  ;;  %p186_p11 = scmp.ne.s32.totalorder %s947_s20, %s943_s19 }
  0x28   : > { %p1101_p12 = por %p68_p10, %p67_p5  ;;  %p187_p13 = scmp.eq.s32.totalorder %s1090_s15, 1 }
  0x29   : > { %s1109_s10 = scalar_select %p1054_p6, %s947_s20, %s176_s30  }
  0x2a   : > { %p1111_p9 = por %p187_p13, %p186_p11  ;;  %p192_p0 = scmp.ne.s32.totalorder %s943_s19, %s939_s18 }
  0x2b   : > { %p193_p1 = scmp.eq.s32.totalorder %s638_s17, 1  ;;  %p651_p2 = scmp.ge.s32.totalorder %s963_s24, 1 }
  0x2c   : > { %p200_p4 = scmp.lt.s32.totalorder %s963_s24, 3  ;;  %s1264_s0 = sld [smem:[#allocation13_spill]] }
  0x2d   : > { %p1119_p7 = por %p193_p1, %p192_p0  ;;  %s283_s13 = sshll.u32 %s1255_s4, 4  ;;  %s284_s13 = int_to_ptr.hbm [resolvable:$true] %s283_s13 }
  0x2e   : > { %p1126_p6 = pnand %p651_p2, %p200_p4  ;;  %s967_s9 = smov [#allocation2]  }
  0x2f   : > { %s214_s14 = sshll.u32 %s967_s9, 4  ;;  %s968_s17 = smov [#allocation7]   ;;  %s215_s14 = int_to_ptr.vmem [resolvable:$true] %s214_s14 }
  0x30   : > { %p693_p5 = pneg %p1126_p6  ;;  %s285_s30 = sshll.u32 %s968_s17, 4  ;;  %s286_s30 = int_to_ptr.vmem [resolvable:$true] %s285_s30 }
  0x31   : > { %p701_p13 = pnand %p709_p8, %p62_p3  ;;  %294 = sbr.rel (%p1126_p6) target bundleno = 425 (0x1a9), region = 40 }
  0x32   : > { %s212_s7 = sshll.u32 %s1264_s0, 4  ;;  %p694_p11 = pnand %p693_p5, %p68_p10  ;;  %s213_s7 = int_to_ptr.hbm [resolvable:$true] %s212_s7 }
  0x33   : > { %703 = dma.hbm_to_vmem [thread:$0]  (!%p701_p13), %s284_s13, 128, %s286_s30, %s1076_s26  }
  0x34   : > { %696 = dma.hbm_to_vmem [thread:$0]  (!%p694_p11), %s213_s7, 128, %s215_s14, [#allocation3]  }
  0x36   : > { %922 = dma.done.wait (%p68_p10), [#allocation3], 128  }
  0x37   : > { %924 = vsyncadd (%p68_p10), [#allocation3], 4294967168  ;;  %s301_s28 = sand.u32 1, %s1090_s15   ;;  %s303_s29 = sand.u32 1, %s955_s22  }
  0x38   : > { %s666_s6 = sshll.u32 %s303_s29, 7  ;;  %s302_s12 = scalar_lea.sflag [#allocation6], %s301_s28 }
  0x39   : > { %s1150_s9 = scalar_lea.vmem [#allocation5], %s666_s6 }
  0x3a   : > { %926 = dma.done.wait (%p1101_p12), %s302_s12, 2048  }
  0x3b   : > { %928 = vsyncadd (%p1101_p12), %s302_s12, 4294965248 }
  0x3c   : > { %930 = dma.done.wait (%p68_p10), %s302_s12, 128  }
  0x3d   : > { %932 = vsyncadd (%p68_p10), %s302_s12, 4294967168  ;;  %s355_s26 = sand.u32 1, %s943_s19   ;;  %p360_p3 = scmp.lt.s32.totalorder %s1090_s15, 0 }
  0x3e   : > { %s668_s7 = sshll.u32 %s355_s26, 3  ;;  %p675_p8 = scmp.ge.s32.totalorder %s1090_s15, 1 }
  0x3f   : > { %s361_s11 = scalar_select %p360_p3, %s1090_s15, 0 }
  0x40   : > { %s1175_s29 = scalar_lea.vmem [#allocation8], %s668_s7  ;;  %382 = sbr.rel (%p675_p8) target bundleno = 401 (0x191), region = 56 }
  0x41   : > { %s1275_s11 = smov (!%p360_p3, %s361_s11), 0 }
  0x42   : > { %s364_s14 = scalar_lea.vmem %s1253_s2, %s1275_s11  ;;  %s371_s28 = scalar_lea.vmem %s1254_s3, %s1275_s11 }
  0x45   : > { %v399_v0 = vld [vmem:[%s1150_s9 + $0x78] sm:$0xff]  ;;  %v398_v1 = vld [vmem:[%s1150_s9 + $0x70] sm:$0xff]  ;;  %v397_v2 = vld [vmem:[%s1150_s9 + $0x68] sm:$0xff]  ;;  %vm422_vm0 = vcmask 64512   ;;  %v969_v19 = vmov 1.0  }
  0x46   : > { %400 = vmatpush.msra.mxu0 %v399_v0  ;;  %v396_v3 = vld [vmem:[%s1150_s9 + $0x60] sm:$0xff]  ;;  %v395_v4 = vld [vmem:[%s1150_s9 + $0x58] sm:$0xff]  ;;  %v394_v5 = vld [vmem:[%s1150_s9 + $0x50] sm:$0xff] }
  0x47   : > { %v393_v6 = vld [vmem:[%s1150_s9 + $0x48] sm:$0xff]  ;;  %v392_v7 = vld [vmem:[%s1150_s9 + $0x40] sm:$0xff]  ;;  %v391_v8 = vld [vmem:[%s1150_s9 + $0x38] sm:$0xff] }
  0x48   : > { %401 = vmatpush.msra.mxu0 %v398_v1  ;;  %v390_v9 = vld [vmem:[%s1150_s9 + $0x30] sm:$0xff]  ;;  %v389_v10 = vld [vmem:[%s1150_s9 + $0x28] sm:$0xff]  ;;  %v388_v11 = vld [vmem:[%s1150_s9 + $0x20] sm:$0xff] }
  0x49   : > { %v387_v12 = vld [vmem:[%s1150_s9 + $0x18] sm:$0xff]  ;;  %v386_v13 = vld [vmem:[%s1150_s9 + $0x10] sm:$0xff]  ;;  %v385_v14 = vld [vmem:[%s1150_s9 + $0x8] sm:$0xff] }
  0x4a   : > { %402 = vmatpush.msra.mxu0 %v397_v2  ;;  %v384_v15 = vld [vmem:[%s1150_s9] sm:$0xff]  ;;  %v383_v16 = vld [vmem:[#allocation2] sm:$0xff] }
  0x4b   : > { %v420_v33 = vld [vmem:[%s364_s14] sm:$0x1] }
  0x4c   : > { %403 = vmatpush.msra.mxu0 %v396_v3  ;;  %v421_v37 = vld [vmem:[%s371_s28] sm:$0x1] }
  0x4e   : > { %404 = vmatpush.msra.mxu0 %v395_v4 }
  0x50   : > { %405 = vmatpush.msra.mxu0 %v394_v5 }
  0x52   : > { %406 = vmatpush.msra.mxu0 %v393_v6 }
  0x54   : > { %407 = vmatpush.msra.mxu0 %v392_v7 }
  0x56   : > { %408 = vmatpush.msra.mxu0 %v391_v8 }
  0x58   : > { %409 = vmatpush.msra.mxu0 %v390_v9 }
  0x5a   : > { %410 = vmatpush.msra.mxu0 %v389_v10 }
  0x5c   : > { %411 = vmatpush.msra.mxu0 %v388_v11 }
  0x5e   : > { %412 = vmatpush.msra.mxu0 %v387_v12 }
  0x60   : > { %413 = vmatpush.msra.mxu0 %v386_v13 }
  0x62   : > { %414 = vmatpush.msra.mxu0 %v385_v14 }
  0x64   : > { %415 = vmatpush.msra.mxu0 %v384_v15 }
  0x65   : > { %416 = vmatmul.f32.vlgmr.msra.gmra.mxu0 %v383_v16 }
  0xe2   : > { %v417_v17 = vpop.f32.mrf.mxu0 }
  0xe3   : > { %441 = vmatpush.msra.mxu1 %v417_v17  ;;  %v446_v18 = vmul.f32 %v417_v17, %v417_v17 }
  0xe4   : > { %676 = vmatmul.msk.f32.vlgmr.msra.gmra.mxu1 %vm422_vm0, %v969_v19 }
  0xe5   : > { %462 = vmatpush.msra.mxu2 %v446_v18 }
  0xe6   : > { %677 = vmatmul.msk.f32.vlgmr.msra.gmra.mxu2 %vm422_vm0, %v969_v19 }
 0x161   : > { %v443_v20 = vpop.f32.mrf.mxu1 }
 0x162   : > { %v467_v21 = vmul.f32 0.125, %v443_v20 }
 0x164   : > { %v469_v22 = vmul.f32 %v467_v21, %v467_v21 }
 0x169   : > { %v464_v23 = vpop.f32.mrf.mxu2 }
 0x16a   : > { %v468_v24 = vmul.f32 0.125, %v464_v23 }
 0x16c   : > { %v470_v25 = vsub.f32 %v468_v24, %v469_v22 }
 0x16e   : > { %v471_v26 = vmax.f32 %v470_v25, 0.0 }
 0x170   : > { %v472_v27 = vadd.f32 1e-05, %v471_v26 }
 0x172   : > { %773 = vrsqrt.f32 %v472_v27  ;;  %vm479_vm2 = vweird.f32 %v472_v27 }
 0x178   : > { %v774_v28 = vpop.eup %773 }
 0x179   : > { %v474_v29 = vmul.f32 %v774_v28, %v472_v27  ;;  %vm480_vm1 = vweird.f32 %v774_v28 }
 0x17a   : > { %vm481_vm3 = vmor %vm479_vm2, %vm480_vm1 }
 0x17b   : > { %v475_v30 = vmul.f32 %v774_v28, %v474_v29 }
 0x17d   : > { %v476_v31 = vmul.f32 0.5, %v475_v30 }
 0x17f   : > { %v477_v32 = vsub.f32 1.5, %v476_v31 }
 0x181   : > { %v478_v34 = vmul.f32 %v774_v28, %v477_v32 }
 0x183   : > { %v482_v35 = vsel %vm481_vm3, %v774_v28, %v478_v34 }
 0x184   : > { %v483_v36 = vmul.f32 %v482_v35, %v420_v33 }
 0x186   : > { %v484_v38 = vmul.f32 %v483_v36, %v467_v21  ;;  %v487_v39 = vperm.slane %v483_v36, 0 }
 0x188   : > { %v485_v40 = vsub.f32 %v421_v37, %v484_v38  ;;  %v489_v41 = vmul.f32 %v487_v39, %v417_v17 }
 0x18a   : > { %v491_v42 = vperm.slane %v485_v40, 0 }
 0x18c   : > { %v493_v43 = vadd.f32 %v491_v42, %v489_v41 }
 0x18e   : > { %v494_v44 = vmax.f32 %v493_v43, 0.0 }
 0x190   : > { %495 = vst [vmem:[%s1175_s29] sm:$0xff] %v494_v44 }
 0x191 PF: > { %p678_p10 = scmp.lt.s32.totalorder %s1090_s15, 1 }
 0x193   : > { %499 = sbr.rel (%p678_p10) target bundleno = 410 (0x19a), region = 60 }
 0x198   : > { %v500_v45 = vld [vmem:[#allocation7] sm:$0xff] }
 0x199   : > { %501 = vst [vmem:[%s1175_s29] sm:$0xff] %v500_v45 }
 0x19a PF: > { %s680_s11 = sshll.u32 %s1090_s15, 3  ;;  %s515_s17 = sshll.u32 %s1175_s29, 4  ;;  %s516_s17 = int_to_ptr.vmem [resolvable:$true] %s515_s17 }
 0x19b   : > { %s513_s14 = scalar_lea.hbm %s1256_s5, %s680_s11  ;;  %s503_s28 = scalar_lea.sflag [#allocation4], %s355_s26 }
 0x19c   : > { %s517_s30 = sshll.u32 %s513_s14, 4  ;;  %s885_s15 = scalar_lea.hbm %s1256_s5, 16  ;;  %s518_s30 = int_to_ptr.hbm [resolvable:$true] %s517_s30 }
 0x19d   : > { %s879_s6 = sshra.s32 %s518_s30, 4  ;;  %s880_s6 = int_to_ptr.hbm [resolvable:$true] %s879_s6 }
 0x19e   : > { %s881_s12 = scalar_lea.hbm %s880_s6, 8  ;;  %p886_p2 = scmp.lt.s32.totalorder %s880_s6, %s1256_s5 }
 0x19f   : > { %p882_p12 = scmp.ne.s32.totalorder %s880_s6, %s881_s12  ;;  %p887_p4 = scmp.lt.s32.totalorder %s885_s15, %s881_s12 }
 0x1a1   : > { %p883_p0 = pnand %p882_p12, %p1111_p9  ;;  %p888_p6 = por %p887_p4, %p886_p2 }
 0x1a3   : > { %p884_p1 = pneg %p883_p0 }
 0x1a5   : > { %p889_p5 = pnand %p888_p6, %p884_p1 }
 0x1a7   : > { %892 = shalt.err (!%p889_p5)
}
 0x1a8   : > { %691 = dma.vmem_to_hbm [thread:$0]  (%p1111_p9), %s516_s17, 128, %s518_s30, %s503_s28  }
 0x1a9 PF: > { %s529_s26 = sand.u32 1, %s939_s18   ;;  %p1266_p11 = scmp.ge.s32.totalorder %s963_s24, 2 }
 0x1aa   : > { %s530_s29 = scalar_lea.sflag [#allocation4], %s529_s26 }
 0x1ab   : > { %p705_p13 = pnand %p1266_p11, %p1119_p7 }
 0x1ad   : > { %p706_p3 = pneg %p705_p13 }
 0x1af   : > { %934 = dma.done.wait (%p706_p3), %s530_s29, 128  }
 0x1b0   : > { %936 = vsyncadd (%p706_p3), %s530_s29, 4294967168  ;;  %p19_p9 = scmp.ge.s32.totalorder %s1036_s25, 4   ;;  %s1267_s18 = smov %s943_s19 }
 0x1b1   : > { %s1268_s19 = smov %s947_s20  ;;  %s1269_s20 = smov %s1109_s10 }
 0x1b2   : > { %s1270_s21 = smov %s955_s22  ;;  %s1271_s22 = smov %s959_s23 }
 0x1b3   : > { %s1272_s23 = smov %s1060_s8  ;;  %s1273_s24 = smov %s1036_s25 }
 0x1b4   :  { %21 = sbr.rel (!%p19_p9) target bundleno = 10 (0xa), region = 115 }
 0x1b9   :  { %536 = vsyncpa [#allocation3], 1 }
 0x1ba   :  { %538 = vsyncpa [#allocation3 + $0x1], 1 }
 0x1bb   :  { %539 = vsyncpa [#allocation6], 1 }
 0x1bc   :  { %541 = vsyncpa [#allocation6 + $0x1], 1 }
 0x1bd   :  { %542 = vsyncpa [#allocation4], 1 }
 0x1be   :  { %544 = vsyncpa [#allocation4 + $0x1], 1 }

</bundles_post_ra>
